<compile_context>
chip_gen: v5e
topology: v5e:2x2
jax: 0.10.0
libtpu: 0.0.40
codegen_flags: <defaults>
</compile_context>

<pallas_src>
import functools

import jax
import jax.numpy as jnp
from jax.experimental import pallas as pl
from jax.experimental.pallas import tpu as pltpu


def _round_up(v, m):
    return (v + m - 1) // m * m


def _uniform_bits(shape, seed_u32, row0_u32, salt):
    """Stateless 32-bit hash of (global_row, col, layer, seed) -> uint32 bits."""
    rows = jax.lax.broadcasted_iota(jnp.int32, shape, 0).astype(jnp.uint32) + row0_u32
    cols = jax.lax.broadcasted_iota(jnp.int32, shape, 1).astype(jnp.uint32)
    x = rows * jnp.uint32(0x9E3779B1) ^ (cols * jnp.uint32(0x85EBCA77))
    x = x + seed_u32 + jnp.uint32((salt * 0x01000193 + 0x7F4A7C15) & 0xFFFFFFFF)
    # murmur3-style finalizer (good avalanche, pure VPU int ops)
    x = x ^ (x >> 16)
    x = x * jnp.uint32(0x7FEB352D)
    x = x ^ (x >> 15)
    x = x * jnp.uint32(0x846CA68B)
    x = x ^ (x >> 16)
    return x


def _make_prenet_kernel(num_layers, tile_b):
    def kernel(seed_ref, *refs):
        # refs = (x_ref, w_0, ..., w_{L-1}, o_ref)
        x_ref = refs[0]
        w_refs = refs[1:1 + num_layers]
        o_ref = refs[1 + num_layers]

        seed = seed_ref[0].astype(jnp.uint32)
        row0 = (pl.program_id(0) * tile_b).astype(jnp.uint32)

        h = x_ref[...]                                      # bf16 (tile_b, Din_pad)
        for layer, w_ref in enumerate(w_refs):
            # Linear (no bias) on the MXU, bf16 inputs, f32 accumulate.
            acc = jnp.dot(h.astype(jnp.bfloat16), w_ref[...],
                          preferred_element_type=jnp.float32)
            # ReLU on the VPU.
            acc = jnp.maximum(acc, 0.0)
            # Dropout(p=0.5, training=True): keep w.p. 0.5, scale kept by 2.
            bits = _uniform_bits(acc.shape, seed, row0, layer)
            keep = (bits & jnp.uint32(0x80000000)) != jnp.uint32(0)
            h = jnp.where(keep, acc + acc, 0.0)             # 2*h folded as h+h
        o_ref[...] = h.astype(o_ref.dtype)

    return kernel


def prenet_forward(x, weights, seed):
    """Fused Prenet forward. x: (B, Din) f32; weights: list of (Din_i, Dout_i) f32
    (already transposed vs. torch's (out, in) layout); seed: int32 scalar."""
    B, Din = x.shape
    num_layers = len(weights)
    dims = [Din] + [w.shape[1] for w in weights]
    for i, w in enumerate(weights):
        assert w.shape[0] == dims[i]

    # Lane-dense padding: every feature dim -> multiple of 128.
    dims_pad = [_round_up(d, 128) for d in dims]
    # Batch: pad to sublane multiple, tile with a parallel grid axis.
    b_pad = _round_up(B, 8)
    tile_b = min(256, b_pad)
    b_pad = _round_up(b_pad, tile_b)
    num_tiles = b_pad // tile_b

    # Zero-pad + bf16 cast (halves HBM->VMEM DMA bytes; zero pads are inert:
    # relu/dropout keep them 0 and padded weight rows are 0).
    x_p = jnp.zeros((b_pad, dims_pad[0]), jnp.bfloat16)
    x_p = x_p.at[:B, :Din].set(x.astype(jnp.bfloat16))
    w_p = []
    for i, w in enumerate(weights):
        wp = jnp.zeros((dims_pad[i], dims_pad[i + 1]), jnp.bfloat16)
        wp = wp.at[:dims[i], :dims[i + 1]].set(w.astype(jnp.bfloat16))
        w_p.append(wp)

    seed_arr = jnp.asarray(seed, jnp.int32).reshape((1,))

    in_specs = [pl.BlockSpec((tile_b, dims_pad[0]), lambda i, seed_ref: (i, 0))]
    for li in range(num_layers):
        in_specs.append(
            pl.BlockSpec((dims_pad[li], dims_pad[li + 1]),
                         lambda i, seed_ref: (0, 0)))  # weights resident across batch tiles

    out = pl.pallas_call(
        _make_prenet_kernel(num_layers, tile_b),
        out_shape=jax.ShapeDtypeStruct((b_pad, dims_pad[-1]), jnp.float32),
        grid_spec=pltpu.PrefetchScalarGridSpec(
            num_scalar_prefetch=1,
            grid=(num_tiles,),
            in_specs=in_specs,
            out_specs=pl.BlockSpec((tile_b, dims_pad[-1]),
                                   lambda i, seed_ref: (i, 0)),
        ),
        compiler_params=pltpu.CompilerParams(
            dimension_semantics=("parallel",)),
    )(seed_arr, x_p, *w_p)

    return out[:B, :dims[-1]]


prenet_forward_jit = jax.jit(prenet_forward)


def xavier_uniform(key, in_dim, out_dim, gain=1.0, dtype=jnp.float32):
    # Matches torch.nn.init.xavier_uniform_ on a (out, in) weight (gain=1 for
    # 'linear'); returns the transposed (in, out) layout used by the kernel.
    bound = gain * (6.0 / (in_dim + out_dim)) ** 0.5
    w = jax.random.uniform(key, (out_dim, in_dim), dtype=dtype,
                           minval=-bound, maxval=bound)
    return w.T  # (in, out)


def make_prenet_params(key, in_dim, sizes):
    in_sizes = [in_dim] + sizes[:-1]
    keys = jax.random.split(key, len(sizes))
    return [xavier_uniform(k, i, o) for k, i, o in zip(keys, in_sizes, sizes)]


if __name__ == "__main__":
    key = jax.random.PRNGKey(0)
    k_param, k_x = jax.random.split(key)

    B = 8          # batch
    IN_DIM = 32    # prenet input dim
    SIZES = [32, 32]

    weights = make_prenet_params(k_param, IN_DIM, SIZES)
    x = jax.random.normal(k_x, (B, IN_DIM), dtype=jnp.float32)

    out = prenet_forward_jit(x, weights, jnp.int32(1234))
    out = jax.block_until_ready(out)

    assert out.shape == (B, SIZES[-1])
    assert out.dtype == jnp.float32
    assert bool(jnp.isfinite(out).all())
    # ReLU + dropout(p=0.5) => many exact zeros, but not all.
    n_zero = int(jnp.sum(out == 0.0))
    assert 0 < n_zero < out.size

    # Different seed -> different dropout mask -> different output.
    out2 = jax.block_until_ready(prenet_forward_jit(x, weights, jnp.int32(999)))
    assert bool(jnp.any(out2 != out))

    print("KERNEL_OK")
</pallas_src>

<mosaic_0001>
module attributes {stable_mosaic.version = 11 : i64} {
  func.func @kernel(%arg0: i32, %arg1: memref<1xi32, #tpu.memory_space<smem>>, %arg2: memref<8x128xbf16, #tpu.memory_space<vmem>>, %arg3: memref<128x128xbf16, #tpu.memory_space<vmem>>, %arg4: memref<128x128xbf16, #tpu.memory_space<vmem>>, %arg5: memref<8x128xf32, #tpu.memory_space<vmem>>) attributes {dimension_semantics = [#tpu.dimension_semantics<parallel>], iteration_bounds = array<i64: 1>, scalar_prefetch = 1 : i64, scratch_operands = 0 : i64, tpu.core_type = #tpu.core_type<tc>, window_params = [{transform_indices = @transform_0, window_bounds = array<i64: 8, 128>}, {pipeline_mode = #tpu.pipeline_mode<synchronous>, transform_indices = @transform_1, window_bounds = array<i64: 128, 128>}, {pipeline_mode = #tpu.pipeline_mode<synchronous>, transform_indices = @transform_2, window_bounds = array<i64: 128, 128>}, {transform_indices = @transform_3, window_bounds = array<i64: 8, 128>}]} {
    %c0 = arith.constant 0 : index
    %0 = memref.load %arg1[%c0] : memref<1xi32, #tpu.memory_space<smem>>
    %c8_i32 = arith.constant 8 : i32
    %1 = arith.muli %arg0, %c8_i32 : i32
    %c0_0 = arith.constant 0 : index
    %c0_1 = arith.constant 0 : index
    %2 = vector.load %arg2[%c0_0, %c0_1] : memref<8x128xbf16, #tpu.memory_space<vmem>>, vector<8x128xbf16>
    %c0_2 = arith.constant 0 : index
    %c0_3 = arith.constant 0 : index
    %3 = vector.load %arg3[%c0_2, %c0_3] : memref<128x128xbf16, #tpu.memory_space<vmem>>, vector<128x128xbf16>
    %cst = arith.constant dense<0.000000e+00> : vector<8x128xf32>
    %4 = tpu.matmul %2, %3, %cst {dimension_numbers = #tpu.dot_dimension_numbers<[1], [0], [0], [1], [0, 0, 1, 1], [], []>} : vector<8x128xbf16>, vector<128x128xbf16>, vector<8x128xf32> -> vector<8x128xf32>
    %cst_4 = arith.constant 0.000000e+00 : f32
    %5 = vector.broadcast %cst_4 : f32 to vector<8x128xf32>
    %6 = arith.maximumf %4, %5 : vector<8x128xf32>
    %7 = tpu.iota {dimensions = array<i32: 0>} : vector<8x128xi32>
    %8 = vector.broadcast %1 : i32 to vector<8x128xi32>
    %9 = arith.addi %7, %8 : vector<8x128xi32>
    %10 = tpu.iota {dimensions = array<i32: 1>} : vector<8x128xi32>
    %c-1640531535_i32 = arith.constant -1640531535 : i32
    %11 = vector.broadcast %c-1640531535_i32 : i32 to vector<8x128xi32>
    %12 = arith.muli %9, %11 : vector<8x128xi32>
    %c-2048144777_i32 = arith.constant -2048144777 : i32
    %13 = vector.broadcast %c-2048144777_i32 : i32 to vector<8x128xi32>
    %14 = arith.muli %10, %13 : vector<8x128xi32>
    %15 = arith.xori %12, %14 : vector<8x128xi32>
    %16 = vector.broadcast %0 : i32 to vector<8x128xi32>
    %17 = arith.addi %15, %16 : vector<8x128xi32>
    %c2135587861_i32 = arith.constant 2135587861 : i32
    %18 = vector.broadcast %c2135587861_i32 : i32 to vector<8x128xi32>
    %19 = arith.addi %17, %18 : vector<8x128xi32>
    %c16_i32 = arith.constant 16 : i32
    %20 = vector.broadcast %c16_i32 : i32 to vector<8x128xi32>
    %21 = arith.shrui %19, %20 : vector<8x128xi32>
    %22 = arith.xori %19, %21 : vector<8x128xi32>
    %c2146121005_i32 = arith.constant 2146121005 : i32
    %23 = vector.broadcast %c2146121005_i32 : i32 to vector<8x128xi32>
    %24 = arith.muli %22, %23 : vector<8x128xi32>
    %c15_i32 = arith.constant 15 : i32
    %25 = vector.broadcast %c15_i32 : i32 to vector<8x128xi32>
    %26 = arith.shrui %24, %25 : vector<8x128xi32>
    %27 = arith.xori %24, %26 : vector<8x128xi32>
    %c-2073254261_i32 = arith.constant -2073254261 : i32
    %28 = vector.broadcast %c-2073254261_i32 : i32 to vector<8x128xi32>
    %29 = arith.muli %27, %28 : vector<8x128xi32>
    %c16_i32_5 = arith.constant 16 : i32
    %30 = vector.broadcast %c16_i32_5 : i32 to vector<8x128xi32>
    %31 = arith.shrui %29, %30 : vector<8x128xi32>
    %32 = arith.xori %29, %31 : vector<8x128xi32>
    %c-2147483648_i32 = arith.constant -2147483648 : i32
    %33 = vector.broadcast %c-2147483648_i32 : i32 to vector<8x128xi32>
    %34 = arith.andi %32, %33 : vector<8x128xi32>
    %c0_i32 = arith.constant 0 : i32
    %35 = vector.broadcast %c0_i32 : i32 to vector<8x128xi32>
    %36 = arith.cmpi ne, %34, %35 : vector<8x128xi32>
    %37 = arith.addf %6, %6 : vector<8x128xf32>
    %cst_6 = arith.constant 0.000000e+00 : f32
    %38 = vector.broadcast %cst_6 : f32 to vector<8x128xf32>
    %39 = arith.select %36, %37, %38 : vector<8x128xi1>, vector<8x128xf32>
    %40 = arith.truncf %39 : vector<8x128xf32> to vector<8x128xbf16>
    %c0_7 = arith.constant 0 : index
    %c0_8 = arith.constant 0 : index
    %41 = vector.load %arg4[%c0_7, %c0_8] : memref<128x128xbf16, #tpu.memory_space<vmem>>, vector<128x128xbf16>
    %cst_9 = arith.constant dense<0.000000e+00> : vector<8x128xf32>
    %42 = tpu.matmul %40, %41, %cst_9 {dimension_numbers = #tpu.dot_dimension_numbers<[1], [0], [0], [1], [0, 0, 1, 1], [], []>} : vector<8x128xbf16>, vector<128x128xbf16>, vector<8x128xf32> -> vector<8x128xf32>
    %cst_10 = arith.constant 0.000000e+00 : f32
    %43 = vector.broadcast %cst_10 : f32 to vector<8x128xf32>
    %44 = arith.maximumf %42, %43 : vector<8x128xf32>
    %45 = tpu.iota {dimensions = array<i32: 0>} : vector<8x128xi32>
    %46 = vector.broadcast %1 : i32 to vector<8x128xi32>
    %47 = arith.addi %45, %46 : vector<8x128xi32>
    %48 = tpu.iota {dimensions = array<i32: 1>} : vector<8x128xi32>
    %c-1640531535_i32_11 = arith.constant -1640531535 : i32
    %49 = vector.broadcast %c-1640531535_i32_11 : i32 to vector<8x128xi32>
    %50 = arith.muli %47, %49 : vector<8x128xi32>
    %c-2048144777_i32_12 = arith.constant -2048144777 : i32
    %51 = vector.broadcast %c-2048144777_i32_12 : i32 to vector<8x128xi32>
    %52 = arith.muli %48, %51 : vector<8x128xi32>
    %53 = arith.xori %50, %52 : vector<8x128xi32>
    %54 = vector.broadcast %0 : i32 to vector<8x128xi32>
    %55 = arith.addi %53, %54 : vector<8x128xi32>
    %c-2142601816_i32 = arith.constant -2142601816 : i32
    %56 = vector.broadcast %c-2142601816_i32 : i32 to vector<8x128xi32>
    %57 = arith.addi %55, %56 : vector<8x128xi32>
    %c16_i32_13 = arith.constant 16 : i32
    %58 = vector.broadcast %c16_i32_13 : i32 to vector<8x128xi32>
    %59 = arith.shrui %57, %58 : vector<8x128xi32>
    %60 = arith.xori %57, %59 : vector<8x128xi32>
    %c2146121005_i32_14 = arith.constant 2146121005 : i32
    %61 = vector.broadcast %c2146121005_i32_14 : i32 to vector<8x128xi32>
    %62 = arith.muli %60, %61 : vector<8x128xi32>
    %c15_i32_15 = arith.constant 15 : i32
    %63 = vector.broadcast %c15_i32_15 : i32 to vector<8x128xi32>
    %64 = arith.shrui %62, %63 : vector<8x128xi32>
    %65 = arith.xori %62, %64 : vector<8x128xi32>
    %c-2073254261_i32_16 = arith.constant -2073254261 : i32
    %66 = vector.broadcast %c-2073254261_i32_16 : i32 to vector<8x128xi32>
    %67 = arith.muli %65, %66 : vector<8x128xi32>
    %c16_i32_17 = arith.constant 16 : i32
    %68 = vector.broadcast %c16_i32_17 : i32 to vector<8x128xi32>
    %69 = arith.shrui %67, %68 : vector<8x128xi32>
    %70 = arith.xori %67, %69 : vector<8x128xi32>
    %c-2147483648_i32_18 = arith.constant -2147483648 : i32
    %71 = vector.broadcast %c-2147483648_i32_18 : i32 to vector<8x128xi32>
    %72 = arith.andi %70, %71 : vector<8x128xi32>
    %c0_i32_19 = arith.constant 0 : i32
    %73 = vector.broadcast %c0_i32_19 : i32 to vector<8x128xi32>
    %74 = arith.cmpi ne, %72, %73 : vector<8x128xi32>
    %75 = arith.addf %44, %44 : vector<8x128xf32>
    %cst_20 = arith.constant 0.000000e+00 : f32
    %76 = vector.broadcast %cst_20 : f32 to vector<8x128xf32>
    %77 = arith.select %74, %75, %76 : vector<8x128xi1>, vector<8x128xf32>
    %c0_21 = arith.constant 0 : index
    %c0_22 = arith.constant 0 : index
    %78 = vector.load %arg5[%c0_21, %c0_22] : memref<8x128xf32, #tpu.memory_space<vmem>>, vector<8x128xf32>
    tpu.vector_store %arg5[%c0_21, %c0_22], %77 {strides = array<i32>} : memref<8x128xf32, #tpu.memory_space<vmem>>, vector<8x128xf32>,
    return
  }
  func.func @transform_0(%arg0: i32, %arg1: memref<1xi32, #tpu.memory_space<smem>>) -> (i32, i32) {
    %c0_i32 = arith.constant 0 : i32
    %c0_i32_0 = arith.constant 0 : i32
    return %arg0, %c0_i32 : i32, i32
  }
  func.func @transform_1(%arg0: i32, %arg1: memref<1xi32, #tpu.memory_space<smem>>) -> (i32, i32) {
    %c0_i32 = arith.constant 0 : i32
    %c0_i32_0 = arith.constant 0 : i32
    %c0_i32_1 = arith.constant 0 : i32
    return %c0_i32, %c0_i32_0 : i32, i32
  }
  func.func @transform_2(%arg0: i32, %arg1: memref<1xi32, #tpu.memory_space<smem>>) -> (i32, i32) {
    %c0_i32 = arith.constant 0 : i32
    %c0_i32_0 = arith.constant 0 : i32
    %c0_i32_1 = arith.constant 0 : i32
    return %c0_i32, %c0_i32_0 : i32, i32
  }
  func.func @transform_3(%arg0: i32, %arg1: memref<1xi32, #tpu.memory_space<smem>>) -> (i32, i32) {
    %c0_i32 = arith.constant 0 : i32
    %c0_i32_0 = arith.constant 0 : i32
    return %arg0, %c0_i32 : i32, i32
  }
}

</mosaic_0001>

<bundles_post_ra>
// kernel: prenet_forward.1
= control target key start
LH: loop header
LB: loop body
LE: loop exit
PB: predicated region body
PF: predicated region fallthrough
CT: control target
= control target key end

     0   :  { %s424_s0 = inlined_call_operand.<no memory space> [shape: s32[1], index: 0, kind: input, shape index: {}]   ;;  %s425_s1 = inlined_call_operand.vmem [shape: bf16[8,128], index: 1, kind: input, shape index: {}]   ;;  %s426_s2 = inlined_call_operand.vmem [shape: bf16[128,128], index: 2, kind: input, shape index: {}]   ;;  %s427_s3 = inlined_call_operand.vmem [shape: bf16[128,128], index: 3, kind: input, shape index: {}]   ;;  %s428_s4 = inlined_call_operand.hbm [shape: f32[8,128], index: 4, kind: output, shape index: {}]  }
   0x1   :  { %v305_v0 = vld [vmem:[%s426_s2 + $0x38] sm:$0xff]  ;;  %v304_v1 = vld [vmem:[%s426_s2 + $0x30] sm:$0xff] }
   0x2   :  { %84 = vmatpush.bf16.msra.mxu0 %v305_v0  ;;  %v313_v2 = vld [vmem:[%s427_s3 + $0x38] sm:$0xff]  ;;  %v312_v3 = vld [vmem:[%s427_s3 + $0x30] sm:$0xff] }
   0x3   :  { %187 = vmatpush.bf16.msra.mxu1 %v313_v2 }
   0x4   :  { %10 = vsyncpa [#allocation5], 0  ;;  %v303_v4 = vld [vmem:[%s426_s2 + $0x28] sm:$0xff]  ;;  %v302_v6 = vld [vmem:[%s426_s2 + $0x20] sm:$0xff]  ;;  %v98_v15 = vlaneseq  ;;  %v107_v21 = vstv %s424_s0  ;;  %s341_s0 = smov [#allocation4]   ;;  %s222_s25 = sshll.u32 %s428_s4, 4  ;;  %s223_s25 = int_to_ptr.hbm [resolvable:$true] %s222_s25 }
   0x5   :  { %v311_v5 = vld [vmem:[%s427_s3 + $0x28] sm:$0xff]  ;;  %v310_v7 = vld [vmem:[%s427_s3 + $0x20] sm:$0xff]  ;;  %v301_v8 = vld [vmem:[%s426_s2 + $0x18] sm:$0xff] }
   0x6   :  { %85 = vmatpush.bf16.msra.mxu0 %v304_v1  ;;  %v309_v9 = vld [vmem:[%s427_s3 + $0x18] sm:$0xff]  ;;  %v300_v10 = vld [vmem:[%s426_s2 + $0x10] sm:$0xff]  ;;  %v299_v12 = vld [vmem:[%s426_s2 + $0x8] sm:$0xff]  ;;  %v99_v16 = vshrl.u32 %v98_v15, 7  ;;  %v103_v17 = vand.u32 127, %v98_v15 }
   0x7   :  { %188 = vmatpush.bf16.msra.mxu1 %v312_v3  ;;  %v308_v11 = vld [vmem:[%s427_s3 + $0x10] sm:$0xff]  ;;  %v298_v13 = vld [vmem:[%s426_s2] sm:$0xff]  ;;  %v307_v25 = vld [vmem:[%s427_s3 + $0x8] sm:$0xff] }
   0x8   :  { %v19_v14 = vld [vmem:[%s425_s1] sm:$0xf]  ;;  %v104_v18 = vmul.u32 2654435761, %v99_v16  ;;  %v105_v19 = vmul.u32 2246822519, %v103_v17 }
   0x9   :  { %v306_v27 = vld [vmem:[%s427_s3] sm:$0xff]  ;;  %s220_s3 = sshll.u32 %s341_s0, 4  ;;  %s221_s3 = int_to_ptr.vmem [resolvable:$true] %s220_s3 }
   0xa   :  { %86 = vmatpush.bf16.msra.mxu0 %v303_v4  ;;  %v106_v20 = vxor.u32 %v105_v19, %v104_v18 }
   0xb   :  { %189 = vmatpush.bf16.msra.mxu1 %v311_v5 }
   0xc   :  { %v108_v22 = vadd.s32 %v107_v21, %v106_v20 }
   0xe   :  { %87 = vmatpush.bf16.msra.mxu0 %v302_v6  ;;  %v109_v23 = vadd.s32 2135587861, %v108_v22  ;;  %v201_v40 = vadd.s32 2152365480, %v108_v22 }
   0xf   :  { %190 = vmatpush.bf16.msra.mxu1 %v310_v7 }
  0x10   :  { %v110_v24 = vshrl.u32 %v109_v23, 16  ;;  %v202_v41 = vshrl.u32 %v201_v40, 16 }
  0x12   :  { %88 = vmatpush.bf16.msra.mxu0 %v301_v8  ;;  %v111_v26 = vxor.u32 %v110_v24, %v109_v23  ;;  %v203_v42 = vxor.u32 %v202_v41, %v201_v40 }
  0x13   :  { %191 = vmatpush.bf16.msra.mxu1 %v309_v9 }
  0x14   :  { %v112_v28 = vmul.u32 2146121005, %v111_v26  ;;  %v204_v43 = vmul.u32 2146121005, %v203_v42 }
  0x16   :  { %89 = vmatpush.bf16.msra.mxu0 %v300_v10  ;;  %v113_v29 = vshrl.u32 %v112_v28, 15  ;;  %v205_v44 = vshrl.u32 %v204_v43, 15 }
  0x17   :  { %192 = vmatpush.bf16.msra.mxu1 %v308_v11 }
  0x18   :  { %v114_v30 = vxor.u32 %v113_v29, %v112_v28  ;;  %v206_v45 = vxor.u32 %v205_v44, %v204_v43 }
  0x1a   :  { %90 = vmatpush.bf16.msra.mxu0 %v299_v12  ;;  %v115_v31 = vmul.u32 2221713035, %v114_v30  ;;  %v207_v46 = vmul.u32 2221713035, %v206_v45 }
  0x1b   :  { %193 = vmatpush.bf16.msra.mxu1 %v307_v25 }
  0x1c   :  { %v116_v32 = vshrl.u32 %v115_v31, 16  ;;  %v208_v47 = vshrl.u32 %v207_v46, 16 }
  0x1e   :  { %91 = vmatpush.bf16.msra.mxu0 %v298_v13  ;;  %v117_v33 = vxor.u32 %v116_v32, %v115_v31  ;;  %v209_v48 = vxor.u32 %v208_v47, %v207_v46 }
  0x1f   :  { %194 = vmatpush.bf16.msra.mxu1 %v306_v27 }
  0x20   :  { %v118_v34 = vand.u32 2147483648, %v117_v33  ;;  %v210_v49 = vand.u32 2147483648, %v209_v48 }
  0x21   :  { %92 = vmatmul.bf16.vlgmr.msra.gmra.mxu0 %v19_v14 }
  0x22   :  { %vm119_vm0 = vcmp.ne.s32.totalorder %v118_v34, 0  ;;  %vm211_vm2 = vcmp.ne.s32.totalorder %v210_v49, 0 }
  0x23   :  { %vm295_vm1 = vmpackc.low %vm119_vm0, %vm119_vm0 }
  0x9e   :  { %v93_v35 = vpop.f32.mrf.mxu0 }
  0x9f   :  { %v97_v36 = vmax.f32 %v93_v35, 0.0 }
  0xa1   :  { %v120_v37 = vadd.f32 %v97_v36, %v97_v36 }
  0xa3   :  { %v296_v38 = vpack.c.bf16 %v120_v37, %v120_v37 }
  0xa5   :  { %297 = vmatmul.msk.bf16.vlgmr.msra.gmra.mxu1 %vm295_vm1, %v296_v38 }
  0xa6   :  { %v95_v39 = vpop.f32.mrf.mxu0 }
 0x122   :  { %v196_v50 = vpop.f32.mrf.mxu1 }
 0x123   :  { %v200_v51 = vmax.f32 %v196_v50, 0.0 }
 0x125   :  { %v212_v52 = vadd.f32 %v200_v51, %v200_v51 }
 0x127   :  { %v213_v53 = vsel %vm211_vm2, %v212_v52, 0.0 }
 0x128   :  { %214 = vst [vmem:[#allocation4] sm:$0xff] %v213_v53 }
 0x129   :  { %225 = dma.vmem_to_hbm [thread:$0]  %s221_s3, 128, %s223_s25, [#allocation5]  }
 0x12a   :  { %v198_v54 = vpop.f32.mrf.mxu1 }
 0x12b   :  { %339 = dma.done.wait [#allocation5], 128  }
 0x12c   :  { %340 = vsyncadd [#allocation5], 4294967168 }
 0x12d   :  { %230 = vsyncpa [#allocation5], 1 }

</bundles_post_ra>
